<compile_context>
chip_gen: v7x
topology: tpu7x:2x2x1
jax: 0.10.0
libtpu: 0.0.40
codegen_flags: <defaults>
</compile_context>

<pallas_src>
import functools

import jax
import jax.numpy as jnp
from jax.experimental import pallas as pl
from jax.experimental.pallas import tpu as pltpu


EMBED_DIM = 50
HIDDEN_DIM = 50
VOCAB_SIZE = 65
LN_EPS = 1e-5          # torch.nn.LayerNorm default

LANE = 128             # padded lane width per hidden / embed / vocab block
NGATE = 3              # fused lanes: [update | reset | candidate]
SUBLANE = 8


# ----------------------------------------------------------------------------
# Parameter init (torch-like) and packing into MXU/DMA-friendly arrays
# ----------------------------------------------------------------------------
def init_params(key, embed_dim=EMBED_DIM, hidden_dim=HIDDEN_DIM,
                vocab_size=VOCAB_SIZE):
    """Deterministic init mimicking torch defaults (uniform +-1/sqrt(fan_in))."""
    ks = jax.random.split(key, 8)
    in_dim = embed_dim + hidden_dim

    def lin(k, fan_in, shape):
        bound = 1.0 / jnp.sqrt(jnp.float32(fan_in))
        return jax.random.uniform(k, shape, jnp.float32, -bound, bound)

    return {
        # Linear weights stored as (in_features, out_features) (= torch W.T),
        # with cat order [h, x] along in_features.
        "W_u": lin(ks[0], in_dim, (in_dim, hidden_dim)),
        "b_u": lin(ks[1], in_dim, (1, hidden_dim)),
        "W_r": lin(ks[2], in_dim, (in_dim, hidden_dim)),
        "b_r": lin(ks[3], in_dim, (1, hidden_dim)),
        "W_h": lin(ks[4], in_dim, (in_dim, hidden_dim)),
        "b_h": lin(ks[5], in_dim, (1, hidden_dim)),
        "W_y": lin(ks[6], hidden_dim, (hidden_dim, vocab_size)),
        "b_y": lin(ks[7], hidden_dim, (1, vocab_size)),
        # LayerNorm affine params (normalized_shape=(1, H) -> ones / zeros)
        "g_u": jnp.ones((1, hidden_dim), jnp.float32),
        "be_u": jnp.zeros((1, hidden_dim), jnp.float32),
        "g_r": jnp.ones((1, hidden_dim), jnp.float32),
        "be_r": jnp.zeros((1, hidden_dim), jnp.float32),
        "g_h": jnp.ones((1, hidden_dim), jnp.float32),
        "be_h": jnp.zeros((1, hidden_dim), jnp.float32),
    }


def _pad_to(x, rows, cols):
    r, c = x.shape
    return jnp.zeros((rows, cols), x.dtype).at[:r, :c].set(x)


def pack_params(params, hidden_dim=HIDDEN_DIM, embed_dim=EMBED_DIM,
                vocab_size=VOCAB_SIZE):
    """Pad + fuse raw parameters (done once at init, outside the hot path)."""
    H, E, V = hidden_dim, embed_dim, vocab_size
    wu_h, wu_x = params["W_u"][:H], params["W_u"][H:]
    wr_h, wr_x = params["W_r"][:H], params["W_r"][H:]
    wh_h, wh_x = params["W_h"][:H], params["W_h"][H:]

    # x-projection weight (used OUTSIDE the recurrent kernel):
    # x_pad (.., LANE) -> [u_x | r_x | cand_x] (.., 3*LANE).  Pad rows/cols 0.
    wfx = jnp.zeros((LANE, NGATE * LANE), jnp.float32)
    wfx = wfx.at[0:E, 0:H].set(wu_x)
    wfx = wfx.at[0:E, LANE:LANE + H].set(wr_x)
    wfx = wfx.at[0:E, 2 * LANE:2 * LANE + H].set(wh_x)

    # h-projection weight (inside the kernel): h -> [u_h | r_h]
    wfh = jnp.zeros((LANE, 2 * LANE), jnp.float32)
    wfh = wfh.at[0:H, 0:H].set(wu_h)
    wfh = wfh.at[0:H, LANE:LANE + H].set(wr_h)

    whh = _pad_to(wh_h, LANE, LANE)           # (h*r) @ Wh_h   (inside kernel)
    wy = _pad_to(params["W_y"], LANE, LANE)   # logits        (outside kernel)

    # fused gate biases (folded into pre_x outside the kernel)
    bias_f = jnp.zeros((1, NGATE * LANE), jnp.float32)
    bias_f = bias_f.at[0, 0:H].set(params["b_u"].reshape(-1))
    bias_f = bias_f.at[0, LANE:LANE + H].set(params["b_r"].reshape(-1))
    bias_f = bias_f.at[0, 2 * LANE:2 * LANE + H].set(params["b_h"].reshape(-1))

    # LayerNorm affine constants for the kernel: row0 = gammas, row1 = betas.
    ln_c = jnp.zeros((2, NGATE * LANE), jnp.float32)
    ln_c = ln_c.at[0, 0:H].set(params["g_u"].reshape(-1))
    ln_c = ln_c.at[0, LANE:LANE + H].set(params["g_r"].reshape(-1))
    ln_c = ln_c.at[0, 2 * LANE:2 * LANE + H].set(params["g_h"].reshape(-1))
    ln_c = ln_c.at[1, 0:H].set(params["be_u"].reshape(-1))
    ln_c = ln_c.at[1, LANE:LANE + H].set(params["be_r"].reshape(-1))
    ln_c = ln_c.at[1, 2 * LANE:2 * LANE + H].set(params["be_h"].reshape(-1))

    b_y = jnp.zeros((1, LANE), jnp.float32).at[0, 0:V].set(
        params["b_y"].reshape(-1))

    return {"Wfx": wfx, "Wfh": wfh, "Whh": whh, "Wy": wy,
            "bias_f": bias_f, "ln": ln_c, "b_y": b_y}


# ----------------------------------------------------------------------------
# Recurrent kernel: TC timesteps per grid step, h carried in VMEM scratch
# ----------------------------------------------------------------------------
def gru_chunk_kernel(px_ref, h0_ref, wfh_ref, whh_ref, ln_ref,
                     hs_ref, h_scr, *, hidden_dim, tc):
    H = hidden_dim
    inv_h = 1.0 / H

    @pl.when(pl.program_id(0) == 0)
    def _():
        h_scr[...] = h0_ref[...]

    # Hoisted: resident weights and LN constants read once per grid step.
    wfh = wfh_ref[...]                       # (LANE, 2*LANE) [u_h | r_h]
    whh = whh_ref[...]                       # (LANE, LANE)
    g_u = ln_ref[0:1, 0:LANE]
    g_r = ln_ref[0:1, LANE:2 * LANE]
    g_h = ln_ref[0:1, 2 * LANE:3 * LANE]
    be_u = ln_ref[1:2, 0:LANE]
    be_r = ln_ref[1:2, LANE:2 * LANE]
    be_h = ln_ref[1:2, 2 * LANE:3 * LANE]

    def ln(zb, gb, bb):
        # Pad lanes of zb are exactly 0 (zero weight cols + zero bias), so
        # sums over all 128 lanes divided by the logical H are exact; biased
        # variance matches torch.  Clamp var at 0 for rsqrt safety.
        mu = jnp.sum(zb, axis=-1, keepdims=True) * inv_h
        var = jnp.maximum(
            jnp.sum(zb * zb, axis=-1, keepdims=True) * inv_h - mu * mu, 0.0)
        return (zb - mu) * jax.lax.rsqrt(var + LN_EPS) * gb + bb

    def step(t, h):
        px = px_ref[t]                       # (BP, 3*LANE): x-proj + biases
        hx = jnp.dot(h, wfh, preferred_element_type=jnp.float32)  # (BP, 2*LANE)
        u = jax.nn.sigmoid(ln(px[:, 0:LANE] + hx[:, 0:LANE], g_u, be_u))
        r = jax.nn.sigmoid(ln(px[:, LANE:2 * LANE] + hx[:, LANE:2 * LANE],
                              g_r, be_r))
        hn_pre = px[:, 2 * LANE:3 * LANE] + jnp.dot(
            h * r, whh, preferred_element_type=jnp.float32)
        h_new = jnp.tanh(ln(hn_pre, g_h, be_h))
        h_t = h + u * (h_new - h)            # pad lanes stay exactly 0
        hs_ref[t] = h_t
        return h_t

    h_final = jax.lax.fori_loop(0, tc, step, h_scr[...], unroll=True)
    h_scr[...] = h_final


# ----------------------------------------------------------------------------
# Wrappers
# ----------------------------------------------------------------------------
@functools.partial(jax.jit, static_argnames=("tc",))
def gru_sequence_forward(xs, h0, packed, tc=8):
    """xs: (T, B, E), h0: (B, H) -> (hs (T, B, H), ys (T, B, V))."""
    T, B, E = xs.shape
    H = h0.shape[-1]
    V = VOCAB_SIZE

    BP = ((B + SUBLANE - 1) // SUBLANE) * SUBLANE
    n_chunks = -(-T // tc)
    T_pad = n_chunks * tc

    xs_p = jnp.zeros((T_pad, BP, LANE), jnp.float32).at[:T, :B, :E].set(xs)
    h0_p = jnp.zeros((BP, LANE), jnp.float32).at[:B, :H].set(h0)

    # Bulk non-recurrent x-projection (+ fused gate biases) for all T steps.
    pre_x = (xs_p.reshape(T_pad * BP, LANE) @ packed["Wfx"]
             + packed["bias_f"]).reshape(T_pad, BP, NGATE * LANE)

    kernel = functools.partial(gru_chunk_kernel, hidden_dim=H, tc=tc)
    const_map = lambda i: (0, 0)

    hs_p = pl.pallas_call(
        kernel,
        out_shape=jax.ShapeDtypeStruct((T_pad, BP, LANE), jnp.float32),
        grid=(n_chunks,),
        in_specs=[
            pl.BlockSpec((tc, BP, NGATE * LANE), lambda i: (i, 0, 0)),  # pre_x
            pl.BlockSpec((BP, LANE), const_map),                        # h0
            pl.BlockSpec((LANE, 2 * LANE), const_map),                  # Wf_h
            pl.BlockSpec((LANE, LANE), const_map),                      # Wh_h
            pl.BlockSpec((2, NGATE * LANE), const_map),                 # LN g/b
        ],
        out_specs=pl.BlockSpec((tc, BP, LANE), lambda i: (i, 0, 0)),    # hs
        scratch_shapes=[pltpu.VMEM((BP, LANE), jnp.float32)],           # carried h
        compiler_params=pltpu.CompilerParams(
            dimension_semantics=("arbitrary",)),                        # sequential carry
    )(pre_x, h0_p, packed["Wfh"], packed["Whh"], packed["ln"])

    # Deferred output projection: one bulk matmul over the whole sequence.
    ys_p = (hs_p.reshape(T_pad * BP, LANE) @ packed["Wy"]
            + packed["b_y"]).reshape(T_pad, BP, LANE)

    return hs_p[:T, :B, :H], ys_p[:T, :B, :V]


def gru_cell_forward(x, h_prev, packed):
    """Matches simple_GRU_cell.forward: x (B,1,E), h_prev (B,1,H) -> (h_t, y_t)."""
    xs = jnp.swapaxes(x, 0, 1)                  # (1, B, E)
    h0 = h_prev[:, 0, :]                        # (B, H)
    hs, ys = gru_sequence_forward(xs, h0, packed, tc=1)
    return jnp.swapaxes(hs, 0, 1), jnp.swapaxes(ys, 0, 1)   # (B,1,H), (B,1,V)


# ----------------------------------------------------------------------------
# Pure-JAX references
# ----------------------------------------------------------------------------
def gru_cell_reference(x, h_prev, params):
    gru_in = jnp.concatenate([h_prev, x], axis=-1)

    def ln(z, g, b):
        mu = jnp.mean(z, axis=-1, keepdims=True)
        var = jnp.mean((z - mu) ** 2, axis=-1, keepdims=True)
        return (z - mu) / jnp.sqrt(var + LN_EPS) * g + b

    u = jax.nn.sigmoid(ln(gru_in @ params["W_u"] + params["b_u"],
                          params["g_u"], params["be_u"]))
    r = jax.nn.sigmoid(ln(gru_in @ params["W_r"] + params["b_r"],
                          params["g_r"], params["be_r"]))
    hn_in = jnp.concatenate([h_prev * r, x], axis=-1)
    h_new = jnp.tanh(ln(hn_in @ params["W_h"] + params["b_h"],
                        params["g_h"], params["be_h"]))
    h_t = (1.0 - u) * h_prev + u * h_new
    y_t = h_t @ params["W_y"] + params["b_y"]
    return h_t, y_t


def gru_sequence_reference(xs, h0, params):
    def step(h, x):
        h_t, y_t = gru_cell_reference(x, h, params)
        return h_t, (h_t, y_t)

    _, (hs, ys) = jax.lax.scan(step, h0, xs)
    return hs, ys


if __name__ == "__main__":
    key = jax.random.PRNGKey(0)
    k_p, k_x, k_h, k_xs = jax.random.split(key, 4)

    B, T = 4, 8
    params = init_params(k_p)
    packed = pack_params(params)            # once, outside the hot loop

    # --- single step (matches the PyTorch module signature) ---
    x = jax.random.normal(k_x, (B, 1, EMBED_DIM), jnp.float32)
    h_prev = jax.random.normal(k_h, (B, 1, HIDDEN_DIM), jnp.float32)
    h_t, y_t = gru_cell_forward(x, h_prev, packed)
    jax.block_until_ready((h_t, y_t))

    h_ref, y_ref = gru_cell_reference(x, h_prev, params)
    assert h_t.shape == (B, 1, HIDDEN_DIM) and y_t.shape == (B, 1, VOCAB_SIZE)
    assert jnp.allclose(h_t, h_ref, atol=1e-4, rtol=1e-4)
    assert jnp.allclose(y_t, y_ref, atol=1e-4, rtol=1e-4)

    # --- fused sequence: chunked time loop inside one pallas_call ---
    xs = jax.random.normal(k_xs, (T, B, EMBED_DIM), jnp.float32)
    h0 = h_prev[:, 0, :]
    # tc=4 -> grid of 2 chunks, exercising the VMEM-scratch carry across steps
    hs, ys = gru_sequence_forward(xs, h0, packed, tc=4)
    jax.block_until_ready((hs, ys))

    hs_ref, ys_ref = gru_sequence_reference(xs, h0, params)
    assert hs.shape == (T, B, HIDDEN_DIM) and ys.shape == (T, B, VOCAB_SIZE)
    assert jnp.allclose(hs, hs_ref, atol=1e-3, rtol=1e-3)
    assert jnp.allclose(ys, ys_ref, atol=1e-3, rtol=1e-3)

    print("KERNEL_OK")
</pallas_src>

<mosaic_0001>
module attributes {stable_mosaic.version = 11 : i64} {
  func.func @gru_chunk_kernel(%arg0: i32, %arg1: memref<1x8x384xf32, #tpu.memory_space<vmem>>, %arg2: memref<8x128xf32, #tpu.memory_space<vmem>>, %arg3: memref<128x256xf32, #tpu.memory_space<vmem>>, %arg4: memref<128x128xf32, #tpu.memory_space<vmem>>, %arg5: memref<2x384xf32, #tpu.memory_space<vmem>>, %arg6: memref<1x8x128xf32, #tpu.memory_space<vmem>>, %arg7: memref<8x128xf32, #tpu.memory_space<vmem>>) attributes {dimension_semantics = [#tpu.dimension_semantics<arbitrary>], iteration_bounds = array<i64: 1>, scalar_prefetch = 0 : i64, scratch_operands = 1 : i64, tpu.core_type = #tpu.core_type<tc>, window_params = [{transform_indices = @transform_0, window_bounds = array<i64: 1, 8, 384>}, {pipeline_mode = #tpu.pipeline_mode<synchronous>, transform_indices = @transform_1, window_bounds = array<i64: 8, 128>}, {pipeline_mode = #tpu.pipeline_mode<synchronous>, transform_indices = @transform_2, window_bounds = array<i64: 128, 256>}, {pipeline_mode = #tpu.pipeline_mode<synchronous>, transform_indices = @transform_3, window_bounds = array<i64: 128, 128>}, {pipeline_mode = #tpu.pipeline_mode<synchronous>, transform_indices = @transform_4, window_bounds = array<i64: 2, 384>}, {transform_indices = @transform_5, window_bounds = array<i64: 1, 8, 128>}]} {
    %c0_i32 = arith.constant 0 : i32
    %0 = arith.cmpi eq, %arg0, %c0_i32 : i32
    %1 = arith.extui %0 : i1 to i32
    %c0_i32_0 = arith.constant 0 : i32
    %2 = arith.cmpi ne, %1, %c0_i32_0 : i32
    scf.if %2 {
      %c0_43 = arith.constant 0 : index
      %c0_44 = arith.constant 0 : index
      %117 = vector.load %arg2[%c0_43, %c0_44] : memref<8x128xf32, #tpu.memory_space<vmem>>, vector<8x128xf32>
      %c0_45 = arith.constant 0 : index
      %c0_46 = arith.constant 0 : index
      %118 = vector.load %arg7[%c0_45, %c0_46] : memref<8x128xf32, #tpu.memory_space<vmem>>, vector<8x128xf32>
      tpu.vector_store %arg7[%c0_45, %c0_46], %117 {strides = array<i32>} : memref<8x128xf32, #tpu.memory_space<vmem>>, vector<8x128xf32>,
    } else {
    }
    %c0 = arith.constant 0 : index
    %c0_1 = arith.constant 0 : index
    %3 = vector.load %arg3[%c0, %c0_1] : memref<128x256xf32, #tpu.memory_space<vmem>>, vector<128x256xf32>
    %c0_2 = arith.constant 0 : index
    %c0_3 = arith.constant 0 : index
    %4 = vector.load %arg4[%c0_2, %c0_3] : memref<128x128xf32, #tpu.memory_space<vmem>>, vector<128x128xf32>
    %c0_4 = arith.constant 0 : index
    %c0_5 = arith.constant 0 : index
    %5 = vector.load %arg5[%c0_4, %c0_5] : memref<2x384xf32, #tpu.memory_space<vmem>>, vector<1x128xf32>
    %c0_6 = arith.constant 0 : index
    %c128 = arith.constant 128 : index
    %6 = vector.load %arg5[%c0_6, %c128] : memref<2x384xf32, #tpu.memory_space<vmem>>, vector<1x128xf32>
    %c0_7 = arith.constant 0 : index
    %c256 = arith.constant 256 : index
    %7 = vector.load %arg5[%c0_7, %c256] : memref<2x384xf32, #tpu.memory_space<vmem>>, vector<1x128xf32>
    %c1 = arith.constant 1 : index
    %c0_8 = arith.constant 0 : index
    %8 = vector.load %arg5[%c1, %c0_8] : memref<2x384xf32, #tpu.memory_space<vmem>>, vector<1x128xf32>
    %c1_9 = arith.constant 1 : index
    %c128_10 = arith.constant 128 : index
    %9 = vector.load %arg5[%c1_9, %c128_10] : memref<2x384xf32, #tpu.memory_space<vmem>>, vector<1x128xf32>
    %c1_11 = arith.constant 1 : index
    %c256_12 = arith.constant 256 : index
    %10 = vector.load %arg5[%c1_11, %c256_12] : memref<2x384xf32, #tpu.memory_space<vmem>>, vector<1x128xf32>
    %c0_13 = arith.constant 0 : index
    %c0_14 = arith.constant 0 : index
    %11 = vector.load %arg7[%c0_13, %c0_14] : memref<8x128xf32, #tpu.memory_space<vmem>>, vector<8x128xf32>
    %c0_i32_15 = arith.constant 0 : i32
    %12 = arith.index_cast %c0_i32_15 : i32 to index
    %c0_16 = arith.constant 0 : index
    %c0_17 = arith.constant 0 : index
    %13 = vector.load %arg1[%12, %c0_16, %c0_17] : memref<1x8x384xf32, #tpu.memory_space<vmem>>, vector<1x8x384xf32>
    %14 = vector.shape_cast %13 : vector<1x8x384xf32> to vector<8x384xf32>
    %cst = arith.constant dense<0.000000e+00> : vector<8x256xf32>
    %15 = tpu.matmul %11, %3, %cst {dimension_numbers = #tpu.dot_dimension_numbers<[1], [0], [0], [1], [0, 0, 1, 1], [], []>} : vector<8x128xf32>, vector<128x256xf32>, vector<8x256xf32> -> vector<8x256xf32>
    %16 = vector.extract_strided_slice %14 {offsets = [0, 0], sizes = [8, 128], strides = [1, 1]} : vector<8x384xf32> to vector<8x128xf32>
    %17 = vector.extract_strided_slice %15 {offsets = [0, 0], sizes = [8, 128], strides = [1, 1]} : vector<8x256xf32> to vector<8x128xf32>
    %18 = arith.addf %16, %17 : vector<8x128xf32>
    %cst_18 = arith.constant dense<0.000000e+00> : vector<8xf32>
    %19 = vector.multi_reduction <add>, %18, %cst_18 [1] : vector<8x128xf32> to vector<8xf32>
    %20 = vector.shape_cast %19 : vector<8xf32> to vector<8x1xf32>
    %cst_19 = arith.constant 2.000000e-02 : f32
    %21 = vector.broadcast %cst_19 : f32 to vector<8x1xf32>
    %22 = arith.mulf %20, %21 : vector<8x1xf32>
    %23 = arith.mulf %18, %18 : vector<8x128xf32>
    %cst_20 = arith.constant dense<0.000000e+00> : vector<8xf32>
    %24 = vector.multi_reduction <add>, %23, %cst_20 [1] : vector<8x128xf32> to vector<8xf32>
    %25 = vector.shape_cast %24 : vector<8xf32> to vector<8x1xf32>
    %cst_21 = arith.constant 2.000000e-02 : f32
    %26 = vector.broadcast %cst_21 : f32 to vector<8x1xf32>
    %27 = arith.mulf %25, %26 : vector<8x1xf32>
    %28 = arith.mulf %22, %22 : vector<8x1xf32>
    %29 = arith.subf %27, %28 : vector<8x1xf32>
    %cst_22 = arith.constant 0.000000e+00 : f32
    %30 = vector.broadcast %cst_22 : f32 to vector<8x1xf32>
    %31 = arith.maximumf %29, %30 : vector<8x1xf32>
    %32 = vector.broadcast %22 : vector<8x1xf32> to vector<8x128xf32>
    %33 = arith.subf %18, %32 : vector<8x128xf32>
    %cst_23 = arith.constant 9.99999974E-6 : f32
    %34 = vector.broadcast %cst_23 : f32 to vector<8x1xf32>
    %35 = arith.addf %31, %34 : vector<8x1xf32>
    %36 = math.rsqrt %35 : vector<8x1xf32>
    %37 = vector.broadcast %36 : vector<8x1xf32> to vector<8x128xf32>
    %38 = arith.mulf %33, %37 : vector<8x128xf32>
    %39 = vector.broadcast %5 : vector<1x128xf32> to vector<8x128xf32>
    %40 = arith.mulf %38, %39 : vector<8x128xf32>
    %41 = vector.broadcast %8 : vector<1x128xf32> to vector<8x128xf32>
    %42 = arith.addf %40, %41 : vector<8x128xf32>
    %43 = arith.negf %42 : vector<8x128xf32>
    %44 = math.exp %43 : vector<8x128xf32>
    %cst_24 = arith.constant 1.000000e+00 : f32
    %45 = vector.broadcast %cst_24 : f32 to vector<8x128xf32>
    %46 = arith.addf %45, %44 : vector<8x128xf32>
    %47 = arith.divf %45, %46 : vector<8x128xf32>
    %48 = vector.extract_strided_slice %14 {offsets = [0, 128], sizes = [8, 128], strides = [1, 1]} : vector<8x384xf32> to vector<8x128xf32>
    %49 = vector.extract_strided_slice %15 {offsets = [0, 128], sizes = [8, 128], strides = [1, 1]} : vector<8x256xf32> to vector<8x128xf32>
    %50 = arith.addf %48, %49 : vector<8x128xf32>
    %cst_25 = arith.constant dense<0.000000e+00> : vector<8xf32>
    %51 = vector.multi_reduction <add>, %50, %cst_25 [1] : vector<8x128xf32> to vector<8xf32>
    %52 = vector.shape_cast %51 : vector<8xf32> to vector<8x1xf32>
    %cst_26 = arith.constant 2.000000e-02 : f32
    %53 = vector.broadcast %cst_26 : f32 to vector<8x1xf32>
    %54 = arith.mulf %52, %53 : vector<8x1xf32>
    %55 = arith.mulf %50, %50 : vector<8x128xf32>
    %cst_27 = arith.constant dense<0.000000e+00> : vector<8xf32>
    %56 = vector.multi_reduction <add>, %55, %cst_27 [1] : vector<8x128xf32> to vector<8xf32>
    %57 = vector.shape_cast %56 : vector<8xf32> to vector<8x1xf32>
    %cst_28 = arith.constant 2.000000e-02 : f32
    %58 = vector.broadcast %cst_28 : f32 to vector<8x1xf32>
    %59 = arith.mulf %57, %58 : vector<8x1xf32>
    %60 = arith.mulf %54, %54 : vector<8x1xf32>
    %61 = arith.subf %59, %60 : vector<8x1xf32>
    %cst_29 = arith.constant 0.000000e+00 : f32
    %62 = vector.broadcast %cst_29 : f32 to vector<8x1xf32>
    %63 = arith.maximumf %61, %62 : vector<8x1xf32>
    %64 = vector.broadcast %54 : vector<8x1xf32> to vector<8x128xf32>
    %65 = arith.subf %50, %64 : vector<8x128xf32>
    %cst_30 = arith.constant 9.99999974E-6 : f32
    %66 = vector.broadcast %cst_30 : f32 to vector<8x1xf32>
    %67 = arith.addf %63, %66 : vector<8x1xf32>
    %68 = math.rsqrt %67 : vector<8x1xf32>
    %69 = vector.broadcast %68 : vector<8x1xf32> to vector<8x128xf32>
    %70 = arith.mulf %65, %69 : vector<8x128xf32>
    %71 = vector.broadcast %6 : vector<1x128xf32> to vector<8x128xf32>
    %72 = arith.mulf %70, %71 : vector<8x128xf32>
    %73 = vector.broadcast %9 : vector<1x128xf32> to vector<8x128xf32>
    %74 = arith.addf %72, %73 : vector<8x128xf32>
    %75 = arith.negf %74 : vector<8x128xf32>
    %76 = math.exp %75 : vector<8x128xf32>
    %cst_31 = arith.constant 1.000000e+00 : f32
    %77 = vector.broadcast %cst_31 : f32 to vector<8x128xf32>
    %78 = arith.addf %77, %76 : vector<8x128xf32>
    %79 = arith.divf %77, %78 : vector<8x128xf32>
    %80 = vector.extract_strided_slice %14 {offsets = [0, 256], sizes = [8, 128], strides = [1, 1]} : vector<8x384xf32> to vector<8x128xf32>
    %81 = arith.mulf %11, %79 : vector<8x128xf32>
    %cst_32 = arith.constant dense<0.000000e+00> : vector<8x128xf32>
    %82 = tpu.matmul %81, %4, %cst_32 {dimension_numbers = #tpu.dot_dimension_numbers<[1], [0], [0], [1], [0, 0, 1, 1], [], []>} : vector<8x128xf32>, vector<128x128xf32>, vector<8x128xf32> -> vector<8x128xf32>
    %83 = arith.addf %80, %82 : vector<8x128xf32>
    %cst_33 = arith.constant dense<0.000000e+00> : vector<8xf32>
    %84 = vector.multi_reduction <add>, %83, %cst_33 [1] : vector<8x128xf32> to vector<8xf32>
    %85 = vector.shape_cast %84 : vector<8xf32> to vector<8x1xf32>
    %cst_34 = arith.constant 2.000000e-02 : f32
    %86 = vector.broadcast %cst_34 : f32 to vector<8x1xf32>
    %87 = arith.mulf %85, %86 : vector<8x1xf32>
    %88 = arith.mulf %83, %83 : vector<8x128xf32>
    %cst_35 = arith.constant dense<0.000000e+00> : vector<8xf32>
    %89 = vector.multi_reduction <add>, %88, %cst_35 [1] : vector<8x128xf32> to vector<8xf32>
    %90 = vector.shape_cast %89 : vector<8xf32> to vector<8x1xf32>
    %cst_36 = arith.constant 2.000000e-02 : f32
    %91 = vector.broadcast %cst_36 : f32 to vector<8x1xf32>
    %92 = arith.mulf %90, %91 : vector<8x1xf32>
    %93 = arith.mulf %87, %87 : vector<8x1xf32>
    %94 = arith.subf %92, %93 : vector<8x1xf32>
    %cst_37 = arith.constant 0.000000e+00 : f32
    %95 = vector.broadcast %cst_37 : f32 to vector<8x1xf32>
    %96 = arith.maximumf %94, %95 : vector<8x1xf32>
    %97 = vector.broadcast %87 : vector<8x1xf32> to vector<8x128xf32>
    %98 = arith.subf %83, %97 : vector<8x128xf32>
    %cst_38 = arith.constant 9.99999974E-6 : f32
    %99 = vector.broadcast %cst_38 : f32 to vector<8x1xf32>
    %100 = arith.addf %96, %99 : vector<8x1xf32>
    %101 = math.rsqrt %100 : vector<8x1xf32>
    %102 = vector.broadcast %101 : vector<8x1xf32> to vector<8x128xf32>
    %103 = arith.mulf %98, %102 : vector<8x128xf32>
    %104 = vector.broadcast %7 : vector<1x128xf32> to vector<8x128xf32>
    %105 = arith.mulf %103, %104 : vector<8x128xf32>
    %106 = vector.broadcast %10 : vector<1x128xf32> to vector<8x128xf32>
    %107 = arith.addf %105, %106 : vector<8x128xf32>
    %108 = math.tanh %107 : vector<8x128xf32>
    %109 = arith.subf %108, %11 : vector<8x128xf32>
    %110 = arith.mulf %47, %109 : vector<8x128xf32>
    %111 = arith.addf %11, %110 : vector<8x128xf32>
    %112 = arith.index_cast %c0_i32_15 : i32 to index
    %c0_39 = arith.constant 0 : index
    %c0_40 = arith.constant 0 : index
    %113 = vector.load %arg6[%112, %c0_39, %c0_40] : memref<1x8x128xf32, #tpu.memory_space<vmem>>, vector<1x8x128xf32>
    %114 = vector.shape_cast %113 : vector<1x8x128xf32> to vector<8x128xf32>
    %115 = vector.shape_cast %111 : vector<8x128xf32> to vector<1x8x128xf32>
    tpu.vector_store %arg6[%112, %c0_39, %c0_40], %115 {strides = array<i32>} : memref<1x8x128xf32, #tpu.memory_space<vmem>>, vector<1x8x128xf32>,
    %c1_i32 = arith.constant 1 : i32
    %c0_41 = arith.constant 0 : index
    %c0_42 = arith.constant 0 : index
    %116 = vector.load %arg7[%c0_41, %c0_42] : memref<8x128xf32, #tpu.memory_space<vmem>>, vector<8x128xf32>
    tpu.vector_store %arg7[%c0_41, %c0_42], %111 {strides = array<i32>} : memref<8x128xf32, #tpu.memory_space<vmem>>, vector<8x128xf32>,
    return
  }
  func.func @transform_0(%arg0: i32) -> (i32, i32, i32) {
    %c0_i32 = arith.constant 0 : i32
    %c0_i32_0 = arith.constant 0 : i32
    %c0_i32_1 = arith.constant 0 : i32
    return %arg0, %c0_i32, %c0_i32_0 : i32, i32, i32
  }
  func.func @transform_1(%arg0: i32) -> (i32, i32) {
    %c0_i32 = arith.constant 0 : i32
    %c0_i32_0 = arith.constant 0 : i32
    %c0_i32_1 = arith.constant 0 : i32
    return %c0_i32, %c0_i32_0 : i32, i32
  }
  func.func @transform_2(%arg0: i32) -> (i32, i32) {
    %c0_i32 = arith.constant 0 : i32
    %c0_i32_0 = arith.constant 0 : i32
    %c0_i32_1 = arith.constant 0 : i32
    return %c0_i32, %c0_i32_0 : i32, i32
  }
  func.func @transform_3(%arg0: i32) -> (i32, i32) {
    %c0_i32 = arith.constant 0 : i32
    %c0_i32_0 = arith.constant 0 : i32
    %c0_i32_1 = arith.constant 0 : i32
    return %c0_i32, %c0_i32_0 : i32, i32
  }
  func.func @transform_4(%arg0: i32) -> (i32, i32) {
    %c0_i32 = arith.constant 0 : i32
    %c0_i32_0 = arith.constant 0 : i32
    %c0_i32_1 = arith.constant 0 : i32
    return %c0_i32, %c0_i32_0 : i32, i32
  }
  func.func @transform_5(%arg0: i32) -> (i32, i32, i32) {
    %c0_i32 = arith.constant 0 : i32
    %c0_i32_0 = arith.constant 0 : i32
    %c0_i32_1 = arith.constant 0 : i32
    return %arg0, %c0_i32, %c0_i32_0 : i32, i32, i32
  }
}

</mosaic_0001>

<bundles_post_ra>
// kernel: gru_sequence_forward.1
= control target key start
LH: loop header
LB: loop body
LE: loop exit
PB: predicated region body
PF: predicated region fallthrough
CT: control target
= control target key end

     0   :  { %v458_v3 = vmov 0.0   ;;  %v459_v61 = vmov 0.0|0.0   ;;  %vm460_vm0 = vmmov 0   ;;  %s688_s2 = inlined_call_operand.vmem [shape: f32[128,256], index: 2, kind: input, shape index: {}]   ;;  %s689_s1 = inlined_call_operand.vmem [shape: f32[8,128], index: 1, kind: input, shape index: {}]   ;;  %s690_s0 = inlined_call_operand.vmem [shape: f32[1,8,384], index: 0, kind: input, shape index: {}]   ;;  %s691_s3 = inlined_call_operand.vmem [shape: f32[128,128], index: 3, kind: input, shape index: {}]   ;;  %s692_s4 = inlined_call_operand.vmem [shape: f32[2,384], index: 4, kind: input, shape index: {}]   ;;  %s693_s5 = inlined_call_operand.vmem [shape: f32[1,8,128], index: 5, kind: output, shape index: {}]  }
   0x1   :  { %v27_v0 = vld [vmem:[%s688_s2 + $0x8] sm:$0xff]  ;;  %v29_v1 = vld [vmem:[%s688_s2 + $0x18] sm:$0xff]  ;;  %v26_v2 = vld [vmem:[%s688_s2] sm:$0xff]  ;;  %148 = vmatprep.mubr.f32.mxu0 %v458_v3  ;;  %415 = vmatprep.subr.bf16.mxu1 %v459_v61 }
   0x2   :  { %v383_v4 = vpack.c.bf16 %v29_v1, %v27_v0  ;;  %v28_v5 = vld [vmem:[%s688_s2 + $0x10] sm:$0xff]  ;;  %v31_v6 = vld [vmem:[%s688_s2 + $0x28] sm:$0xff]  ;;  %v33_v7 = vld [vmem:[%s688_s2 + $0x38] sm:$0xff]  ;;  %380 = vmatprep.mubr.msk.f32.mxu1 %vm460_vm0, %v458_v3 }
   0x3   :  { %v385_v8 = vpack.c.bf16 %v28_v5, %v26_v2  ;;  %v387_v9 = vpack.c.bf16 %v33_v7, %v31_v6  ;;  %v30_v10 = vld [vmem:[%s688_s2 + $0x20] sm:$0xff]  ;;  %v32_v11 = vld [vmem:[%s688_s2 + $0x30] sm:$0xff]  ;;  %v35_v12 = vld [vmem:[%s688_s2 + $0x48] sm:$0xff] }
   0x4   :  { %384 = vmatprep.subr.bf16.mxu0 %v383_v4  ;;  %v37_v13 = vld [vmem:[%s688_s2 + $0x58] sm:$0xff]  ;;  %v389_v14 = vpack.c.bf16 %v32_v11, %v30_v10  ;;  %v34_v16 = vld [vmem:[%s688_s2 + $0x40] sm:$0xff]  ;;  %v36_v17 = vld [vmem:[%s688_s2 + $0x50] sm:$0xff] }
   0x5   :  { %386 = vmatpush1.bf16.msra.mxu0 %v385_v8  ;;  %v391_v15 = vpack.c.bf16 %v37_v13, %v35_v12  ;;  %v39_v18 = vld [vmem:[%s688_s2 + $0x68] sm:$0xff]  ;;  %v41_v19 = vld [vmem:[%s688_s2 + $0x78] sm:$0xff]  ;;  %v393_v20 = vpack.c.bf16 %v36_v17, %v34_v16  ;;  %v38_v22 = vld [vmem:[%s688_s2 + $0x60] sm:$0xff] }
   0x6   :  { %388 = vmatprep.subr.bf16.mxu0 %v387_v9  ;;  %v395_v21 = vpack.c.bf16 %v41_v19, %v39_v18  ;;  %v40_v23 = vld [vmem:[%s688_s2 + $0x70] sm:$0xff]  ;;  %v43_v24 = vld [vmem:[%s688_s2 + $0x88] sm:$0xff]  ;;  %v45_v25 = vld [vmem:[%s688_s2 + $0x98] sm:$0xff] }
   0x7   :  { %v397_v26 = vpack.c.bf16 %v40_v23, %v38_v22  ;;  %v399_v27 = vpack.c.bf16 %v45_v25, %v43_v24  ;;  %v42_v28 = vld [vmem:[%s688_s2 + $0x80] sm:$0xff]  ;;  %v44_v29 = vld [vmem:[%s688_s2 + $0x90] sm:$0xff]  ;;  %v47_v30 = vld [vmem:[%s688_s2 + $0xa8] sm:$0xff] }
   0x8   :  { %v49_v31 = vld [vmem:[%s688_s2 + $0xb8] sm:$0xff]  ;;  %v401_v32 = vpack.c.bf16 %v44_v29, %v42_v28  ;;  %v46_v34 = vld [vmem:[%s688_s2 + $0xa0] sm:$0xff]  ;;  %v48_v35 = vld [vmem:[%s688_s2 + $0xb0] sm:$0xff] }
   0x9   :  { %390 = vmatpush1.bf16.msra.mxu0 %v389_v14  ;;  %v403_v33 = vpack.c.bf16 %v49_v31, %v47_v30  ;;  %v51_v36 = vld [vmem:[%s688_s2 + $0xc8] sm:$0xff]  ;;  %v53_v37 = vld [vmem:[%s688_s2 + $0xd8] sm:$0xff]  ;;  %v405_v38 = vpack.c.bf16 %v48_v35, %v46_v34  ;;  %v50_v40 = vld [vmem:[%s688_s2 + $0xc0] sm:$0xff] }
   0xa   :  { %392 = vmatprep.subr.bf16.mxu0 %v391_v15  ;;  %v407_v39 = vpack.c.bf16 %v53_v37, %v51_v36  ;;  %v52_v41 = vld [vmem:[%s688_s2 + $0xd0] sm:$0xff]  ;;  %v55_v42 = vld [vmem:[%s688_s2 + $0xe8] sm:$0xff]  ;;  %v57_v43 = vld [vmem:[%s688_s2 + $0xf8] sm:$0xff] }
   0xb   :  { %v409_v44 = vpack.c.bf16 %v52_v41, %v50_v40  ;;  %v411_v45 = vpack.c.bf16 %v57_v43, %v55_v42  ;;  %v54_v46 = vld [vmem:[%s688_s2 + $0xe0] sm:$0xff]  ;;  %v56_v47 = vld [vmem:[%s688_s2 + $0xf0] sm:$0xff]  ;;  %v82_v51 = vld [vmem:[%s690_s0 + $0x8] sm:$0xff] }
   0xc   :  { %v413_v48 = vpack.c.bf16 %v56_v47, %v54_v46  ;;  %v591_v49 = vld [vmem:[%s689_s1] sm:$0xff]  ;;  %v59_v59 = vld [vmem:[%s691_s3 + $0x8] sm:$0xff]  ;;  %v60_v62 = vld [vmem:[%s691_s3 + $0x10] sm:$0xff] }
   0xd   :  { %394 = vmatpush1.bf16.msra.mxu0 %v393_v20  ;;  %v81_v50 = vld [vmem:[%s690_s0] sm:$0xff]  ;;  %v61_v63 = vld [vmem:[%s691_s3 + $0x18] sm:$0xff]  ;;  %v63_v2 = vld [vmem:[%s691_s3 + $0x28] sm:$0xff] }
   0xe   :  { %396 = vmatprep.subr.bf16.mxu0 %v395_v21  ;;  %v58_v58 = vld [vmem:[%s691_s3] sm:$0xff]  ;;  %v419_v0 = vpack.c.bf16 %v61_v63, %v60_v62  ;;  %v64_v5 = vld [vmem:[%s691_s3 + $0x30] sm:$0xff]  ;;  %v65_v6 = vld [vmem:[%s691_s3 + $0x38] sm:$0xff] }
   0xf   :  { %v416_v60 = vpack.c.bf16 %v59_v59, %v58_v58  ;;  %v62_v1 = vld [vmem:[%s691_s3 + $0x20] sm:$0xff]  ;;  %v425_v7 = vpack.c.bf16 %v65_v6, %v64_v5  ;;  %v67_v9 = vld [vmem:[%s691_s3 + $0x48] sm:$0xff]  ;;  %v68_v11 = vld [vmem:[%s691_s3 + $0x50] sm:$0xff] }
  0x10   :  { %v422_v4 = vpack.c.bf16 %v63_v2, %v62_v1  ;;  %v66_v8 = vld [vmem:[%s691_s3 + $0x40] sm:$0xff]  ;;  %v69_v12 = vld [vmem:[%s691_s3 + $0x58] sm:$0xff]  ;;  %v71_v15 = vld [vmem:[%s691_s3 + $0x68] sm:$0xff] }
  0x11   :  { %398 = vmatpush1.bf16.msra.mxu0 %v397_v26  ;;  %417 = vmatpush3.bf16.msra.mxu1 %v416_v60  ;;  %v428_v10 = vpack.c.bf16 %v67_v9, %v66_v8  ;;  %v70_v13 = vld [vmem:[%s691_s3 + $0x60] sm:$0xff]  ;;  %v431_v14 = vpack.c.bf16 %v69_v12, %v68_v11  ;;  %v72_v17 = vld [vmem:[%s691_s3 + $0x70] sm:$0xff]  ;;  %v73_v18 = vld [vmem:[%s691_s3 + $0x78] sm:$0xff] }
  0x12   :  { %400 = vmatprep.subr.bf16.mxu0 %v399_v27  ;;  %418 = vmatprep.subr.bf16.mxu1 %v459_v61  ;;  %v434_v16 = vpack.c.bf16 %v71_v15, %v70_v13  ;;  %v437_v19 = vpack.c.bf16 %v73_v18, %v72_v17  ;;  %v326_v29 = vld [vmem:[%s692_s4 + $0x2] ss:$0 sm:$0xff]  ;;  %v327_v31 = vld [vmem:[%s692_s4 + $0x3] ss:$0 sm:$0xff]  ;;  %v329_v8 = vld [vmem:[%s692_s4 + $0x4] ss:$0 sm:$0xff] }
  0x13   :  { %v330_v11 = vld [vmem:[%s692_s4 + $0x5] ss:$0 sm:$0xff] }
  0x15   :  { %402 = vmatpush1.bf16.msra.mxu0 %v401_v32  ;;  %420 = vmatpush3.bf16.msra.mxu1 %v419_v0 }
  0x16   :  { %404 = vmatprep.subr.bf16.mxu0 %v403_v33  ;;  %421 = vmatprep.subr.bf16.mxu1 %v459_v61 }
  0x19   :  { %406 = vmatpush1.bf16.msra.mxu0 %v405_v38  ;;  %423 = vmatpush3.bf16.msra.mxu1 %v422_v4 }
  0x1a   :  { %408 = vmatprep.subr.bf16.mxu0 %v407_v39  ;;  %424 = vmatprep.subr.bf16.mxu1 %v459_v61  ;;  %v83_v39 = vld [vmem:[%s690_s0 + $0x10] sm:$0xff] }
  0x1d   :  { %410 = vmatpush1.bf16.msra.mxu0 %v409_v44  ;;  %426 = vmatpush3.bf16.msra.mxu1 %v425_v7 }
  0x1e   :  { %412 = vmatprep.subr.bf16.mxu0 %v411_v45  ;;  %427 = vmatprep.subr.bf16.mxu1 %v459_v61 }
  0x21   :  { %414 = vmatpush1.bf16.msra.mxu0 %v413_v48  ;;  %429 = vmatpush3.bf16.msra.mxu1 %v428_v10 }
  0x22   :  { %430 = vmatprep.subr.bf16.mxu1 %v459_v61 }
  0x24   :  { %149 = vmatmul.mubr.f32.vlgmr.msra.gmra.mrb[0].mxu0 %v591_v49 }
  0x25   :  { %432 = vmatpush3.bf16.msra.mxu1 %v431_v14 }
  0x26   :  { %433 = vmatprep.subr.bf16.mxu1 %v459_v61 }
  0x29   :  { %435 = vmatpush3.bf16.msra.mxu1 %v434_v16 }
  0x2a   :  { %436 = vmatprep.subr.bf16.mxu1 %v459_v61  ;;  %v324_v61 = vld [vmem:[%s692_s4 + $0x1] ss:$0 sm:$0xff] }
  0x2d   :  { %438 = vmatpush3.bf16.msra.mxu1 %v437_v19 }
  0xf7   :  { %v150_v52 = vpop.f32.mrb[0].mxu0 }
  0xf8   :  { %v600_v53 = vadd.f32 %v150_v52, %v81_v50  ;;  %v152_v54 = vpop.f32.mrb[1].mxu0 }
  0xf9   :  { %v602_v55 = vadd.f32 %v152_v54, %v82_v51 }
  0xfa   :  { %156 = vadd.xlane.f32.xlu1 %v600_v53  ;;  %v159_v56 = vmul.f32 %v600_v53, %v600_v53 }
  0xfb   :  { %187 = vadd.xlane.f32.xlu0 %v602_v55  ;;  %v190_v57 = vmul.f32 %v602_v55, %v602_v55 }
  0xfe   :  { %160 = vadd.xlane.f32.xlu1 %v159_v56 }
  0xff   :  { %191 = vadd.xlane.f32.xlu0 %v190_v57  ;;  %v323_v57 = vld [vmem:[%s692_s4] ss:$0 sm:$0xff] }
 0x187   :  { %v157_v44 = vpop.xlane.xlu1 %156 }
 0x188   :  { %v188_v20 = vpop.xlane.xlu0 %187  ;;  %v158_v46 = vmul.f32 0.02, %v157_v44 }
 0x189   :  { %v189_v21 = vmul.f32 0.02, %v188_v20 }
 0x18a   :  { %v163_v48 = vmul.f32 %v158_v46, %v158_v46 }
 0x18b   :  { %v194_v23 = vmul.f32 %v189_v21, %v189_v21  ;;  %v197_v27 = vsub.f32 %v602_v55, %v189_v21  ;;  %v161_v45 = vpop.xlane.xlu1 %160  ;;  %v166_v55 = vsub.f32 %v600_v53, %v158_v46 }
 0x18c   :  { %v192_v22 = vpop.xlane.xlu0 %191  ;;  %v162_v47 = vmul.f32 0.02, %v161_v45 }
 0x18d   :  { %v193_v3 = vmul.f32 0.02, %v192_v22 }
 0x18e   :  { %v164_v50 = vsub.f32 %v162_v47, %v163_v48 }
 0x18f   :  { %v195_v24 = vsub.f32 %v193_v3, %v194_v23 }
 0x190   :  { %v165_v51 = vmax.f32 %v164_v50, 0.0 }
 0x191   :  { %v196_v25 = vmax.f32 %v195_v24, 0.0 }
 0x192   :  { %v167_v52 = vadd.f32 1e-05, %v165_v51 }
 0x193   :  { %v198_v26 = vadd.f32 1e-05, %v196_v25 }
 0x195   :  { %442 = vrsqrt.f32 %v198_v26 }
 0x19f   :  { %v443_v28 = vpop.eup %442 }
 0x1a0   :  { %v200_v30 = vmul.f32 %v443_v28, %v197_v27 }
 0x1a2   :  { %v205_v32 = vmul.f32 %v326_v29, %v200_v30 }
 0x1a4   :  { %v210_v33 = vadd.f32 %v327_v31, %v205_v32 }
 0x1a6   :  { %v328_v34 = vmul.f32 -1.442695, %v210_v33 }
 0x1a8   :  { %444 = vpow2.f32 %v328_v34 }
 0x1b2   :  { %v445_v35 = vpop.eup %444 }
 0x1b3   :  { %v214_v36 = vadd.f32 1.0, %v445_v35 }
 0x1b5   :  { %446 = vrcp.f32 %v214_v36 }
 0x1b6   :  { %448 = vrsqrt.f32 %v167_v52 }
 0x1bf   :  { %v447_v37 = vpop.eup %446 }
 0x1c0   :  { %v217_v38 = vmul.f32 %v447_v37, %v591_v49  ;;  %v449_v54 = vpop.eup %448 }
 0x1c1   :  { %v169_v56 = vmul.f32 %v449_v54, %v166_v55 }
 0x1c2   :  { %381 = vmatmul.mubr.f32.vlgmr.msra.gmra.mrb[0].mxu1 %v217_v38 }
 0x1c3   :  { %v174_v59 = vmul.f32 %v323_v57, %v169_v56 }
 0x1c5   :  { %v179_v1 = vadd.f32 %v324_v61, %v174_v59 }
 0x1c7   :  { %v325_v5 = vmul.f32 -1.442695, %v179_v1 }
 0x295   :  { %v284_v40 = vpop.f32.mrb[0].mxu1 }
 0x296   :  { %v288_v41 = vadd.f32 %v284_v40, %v83_v39  ;;  %v382_v42 = vpop.f32.mrb[1].mxu1 }
 0x298   :  { %289 = vadd.xlane.f32.xlu0 %v288_v41  ;;  %v292_v43 = vmul.f32 %v288_v41, %v288_v41 }
 0x29a   :  { %293 = vadd.xlane.f32.xlu1 %v292_v43 }
 0x325   :  { %v290_v58 = vpop.xlane.xlu0 %289 }
 0x326   :  { %v291_v60 = vmul.f32 0.02, %v290_v58 }
 0x327   :  { %v294_v62 = vpop.xlane.xlu1 %293 }
 0x328   :  { %v296_v63 = vmul.f32 %v291_v60, %v291_v60  ;;  %v295_v0 = vmul.f32 0.02, %v294_v62  ;;  %v299_v6 = vsub.f32 %v288_v41, %v291_v60 }
 0x32a   :  { %v297_v2 = vsub.f32 %v295_v0, %v296_v63 }
 0x32c   :  { %v298_v4 = vmax.f32 %v297_v2, 0.0 }
 0x32e   :  { %v300_v53 = vadd.f32 1e-05, %v298_v4 }
 0x330   :  { %450 = vrsqrt.f32 %v300_v53 }
 0x331   :  { %452 = vpow2.f32 %v325_v5 }
 0x33a   :  { %v451_v7 = vpop.eup %450 }
 0x33b   :  { %v302_v9 = vmul.f32 %v451_v7, %v299_v6  ;;  %v453_v10 = vpop.eup %452 }
 0x33c   :  { %v183_v13 = vadd.f32 1.0, %v453_v10 }
 0x33d   :  { %v307_v12 = vmul.f32 %v329_v8, %v302_v9 }
 0x33f   :  { %v312_v14 = vadd.f32 %v330_v11, %v307_v12 }
 0x341   :  { %454 = vtanh.f32 %v312_v14 }
 0x342   :  { %456 = vrcp.f32 %v183_v13 }
 0x34b   :  { %v455_v15 = vpop.eup %454 }
 0x34c   :  { %v314_v16 = vsub.f32 %v455_v15, %v591_v49  ;;  %v457_v17 = vpop.eup %456 }
 0x34e   :  { %v315_v18 = vmul.f32 %v457_v17, %v314_v16 }
 0x350   :  { %v316_v19 = vadd.f32 %v315_v18, %v591_v49 }
 0x352   :  { %317 = vst [vmem:[%s693_s5] sm:$0xff] %v316_v19 }

</bundles_post_ra>
